<compile_context>
chip_gen: v6e
topology: v6e:2x2x1
jax: 0.10.0
libtpu: 0.0.40
codegen_flags: <defaults>
</compile_context>

<pallas_src>
import functools

import jax
import jax.numpy as jnp
from jax.experimental import pallas as pl
from jax.experimental.pallas import tpu as pltpu


def _cdiv(a, b):
    return -(-a // b)


def _round_up(a, m):
    return _cdiv(a, m) * m


def _mlp_ws_kernel(x_ref, w1_ref, w2_ref, w3_ref, w4_ref, w5_ref, b_ref,
                   out_ref, *, h1, h2):
    """One batch tile.

    x_ref : [tb, 392] f32   lanes 0:196 = u digit, lanes 196:392 = v digit
    w1    : [196, h1]       w2: [h1, h2]     w3: [h2, 128] (fc3 out 10->128)
    w4    : [256, 128]      rows 0:128 = padded W4[:10], rows 128:256 = W4[10:]
    w5    : [128, 128]      (fc5 padded 100->128 in, 2->128 out)
    b_ref : [1, h1+h2+384]  packed f32 biases (b1 | b2 | b3p | b4p | b5p)
    out   : [tb, 2] f32     the two logits
    """
    f32 = jnp.float32
    cdt = w1_ref.dtype  # MXU operand dtype (f32 or bf16); accumulation is f32.

    b1 = b_ref[:, 0:h1]
    b2 = b_ref[:, h1:h1 + h2]
    b3 = b_ref[:, h1 + h2:h1 + h2 + 128]
    b4 = b_ref[:, h1 + h2 + 128:h1 + h2 + 256]
    b5 = b_ref[:, h1 + h2 + 256:h1 + h2 + 384]

    xall = x_ref[...]
    u = xall[:, 0:196].astype(cdt)
    v = xall[:, 196:392].astype(cdt)

    def trunk(t):
        a1 = jnp.maximum(
            jnp.dot(t, w1_ref[...], preferred_element_type=f32) + b1, 0.0)
        a2 = jnp.maximum(
            jnp.dot(a1.astype(cdt), w2_ref[...],
                    preferred_element_type=f32) + b2, 0.0)
        a3 = jnp.maximum(
            jnp.dot(a2.astype(cdt), w3_ref[...],
                    preferred_element_type=f32) + b3, 0.0)
        # a3 lanes 10:128 are exactly zero (zero-padded w3/b3 + ReLU).
        return a3.astype(cdt)

    a3u = trunk(u)
    a3v = trunk(v)

    # Combine stage: two K=128 dots on static, tile-aligned weight slices
    # (no activation concat / relayout).
    z = (jnp.dot(a3u, w4_ref[0:128, :], preferred_element_type=f32) +
         jnp.dot(a3v, w4_ref[128:256, :], preferred_element_type=f32))
    a4 = jnp.maximum(z + b4, 0.0)
    a5 = jnp.dot(a4.astype(cdt), w5_ref[...], preferred_element_type=f32) + b5
    out_ref[...] = a5[:, 0:2].astype(out_ref.dtype)


def _prepare_params(params, compute_dtype):
    """Pad/pack the torch-style parameters into lane-dense kernel operands."""
    w1, b1, w2, b2, w3, b3, w4, b4, w5, b5 = params
    h1 = w1.shape[1]          # 256
    h2 = w2.shape[1]          # 128
    h4 = w4.shape[1]          # 100

    # fc3: out 10 -> 128
    w3p = jnp.zeros((h2, 128), jnp.float32).at[:, :10].set(w3)
    b3p = jnp.zeros((128,), jnp.float32).at[:10].set(b3)
    # fc4: split u/v input halves, pad each to [128,128], stack -> [256,128]
    w4u = jnp.zeros((128, 128), jnp.float32).at[:10, :h4].set(w4[:10])
    w4v = jnp.zeros((128, 128), jnp.float32).at[:10, :h4].set(w4[10:])
    w4p = jnp.concatenate([w4u, w4v], axis=0)
    b4p = jnp.zeros((128,), jnp.float32).at[:h4].set(b4)
    # fc5: [100,2] -> [128,128]
    w5p = jnp.zeros((128, 128), jnp.float32).at[:h4, :2].set(w5)
    b5p = jnp.zeros((128,), jnp.float32).at[:2].set(b5)

    bias = jnp.concatenate([b1, b2, b3p, b4p, b5p]).reshape(1, -1)  # [1, h1+h2+384]

    return (w1.astype(compute_dtype), w2.astype(compute_dtype),
            w3p.astype(compute_dtype), w4p.astype(compute_dtype),
            w5p.astype(compute_dtype), bias.astype(jnp.float32), h1, h2)


def mlp_ws_forward(x, params, *, tb=1024, compute_dtype=jnp.float32):
    """x: [B, 2, 14, 14] float32  ->  [B, 2] float32.

    tb: batch rows per grid step.  ~11 KB VMEM per row (f32) + ~1.5 MB resident
        weights; tb=1024 fits every generation's scoped default, v6e can go
        2048-3072, keep <=2048 on v7x (64 MiB VMEM per TensorCore).
    compute_dtype=jnp.bfloat16: bf16 MXU operands, f32 accumulate and f32
        bias/ReLU math (recommended for speed; not bit-identical to f32).
    """
    B = x.shape[0]
    w1, w2, w3p, w4p, w5p, bias, h1, h2 = _prepare_params(params, compute_dtype)

    # Free view: row b = [u_b.flatten() | v_b.flatten()] (392 lanes). x stays
    # f32 in HBM; the (cheap, VPU) cast to compute_dtype happens in-kernel so
    # we never add an extra HBM pass over the input.
    x2 = x.reshape(B, 392).astype(jnp.float32)

    # ---- tile-size selection -------------------------------------------------
    tb = int(tb)
    if tb >= B:
        tb_eff, num_tiles = B, 1          # block == full array dims: always legal
    else:
        tb_eff = max(8, (tb // 8) * 8)    # f32 sublane granule
        num_tiles = _cdiv(B, tb_eff)
        # Best effort: even tile count so v7x megacore splits the batch evenly.
        if num_tiles > 1 and num_tiles % 2 == 1:
            cand = _round_up(_cdiv(B, num_tiles + 1), 8)
            if cand >= 8 and _cdiv(B, cand) % 2 == 0:
                tb_eff, num_tiles = cand, _cdiv(B, cand)
    Bp = num_tiles * tb_eff
    if Bp != B:
        x2 = jnp.pad(x2, ((0, Bp - B), (0, 0)))

    # ---- VMEM budget (raise v5e's 16 MiB scoped default for big tiles) ------
    est_vmem = 12 * 1024 * tb_eff + (4 << 20)   # rough bytes: blocks + temps + weights
    vmem_limit = None
    if est_vmem > (14 << 20):
        vmem_limit = int(min(est_vmem + (8 << 20), 96 << 20))

    kernel = functools.partial(_mlp_ws_kernel, h1=h1, h2=h2)

    out = pl.pallas_call(
        kernel,
        out_shape=jax.ShapeDtypeStruct((Bp, 2), jnp.float32),
        grid_spec=pltpu.PrefetchScalarGridSpec(
            num_scalar_prefetch=0,
            grid=(num_tiles,),
            in_specs=[
                pl.BlockSpec((tb_eff, 392), lambda i: (i, 0)),       # x (u|v lanes)
                pl.BlockSpec((196, h1), lambda i: (0, 0)),           # w1 (resident)
                pl.BlockSpec((h1, h2), lambda i: (0, 0)),            # w2
                pl.BlockSpec((h2, 128), lambda i: (0, 0)),           # w3 (padded)
                pl.BlockSpec((256, 128), lambda i: (0, 0)),          # w4 (u|v halves)
                pl.BlockSpec((128, 128), lambda i: (0, 0)),          # w5 (padded)
                pl.BlockSpec((1, h1 + h2 + 384), lambda i: (0, 0)),  # packed biases
            ],
            out_specs=pl.BlockSpec((tb_eff, 2), lambda i: (i, 0)),   # dense 2-lane out
        ),
        compiler_params=pltpu.CompilerParams(
            dimension_semantics=("parallel",),   # batch tiles shard across v7x's 2 TCs
            vmem_limit_bytes=vmem_limit,
        ),
    )(x2, w1, w2, w3p, w4p, w5p, bias)

    return out[:B]


def init_params(key, nb_hidden1=256, nb_hidden4=100):
    """Deterministic init mimicking torch.nn.Linear (uniform +/- 1/sqrt(fan_in)).

    Weights are stored [in, out]."""
    dims = [
        (196, nb_hidden1),               # fc1
        (nb_hidden1, nb_hidden1 // 2),   # fc2
        (nb_hidden1 // 2, 10),           # fc3
        (20, nb_hidden4),                # fc4
        (nb_hidden4, 2),                 # fc5
    ]
    params = []
    for (fan_in, fan_out) in dims:
        key, kw, kb = jax.random.split(key, 3)
        bound = 1.0 / jnp.sqrt(fan_in)
        w = jax.random.uniform(kw, (fan_in, fan_out), jnp.float32, -bound, bound)
        b = jax.random.uniform(kb, (fan_out,), jnp.float32, -bound, bound)
        params += [w, b]
    return tuple(params)


def reference_forward(x, params, compute_dtype=jnp.float32):
    """Plain-JAX reference replicating the PyTorch forward.

    With compute_dtype=bfloat16 it mirrors the kernel's cast points (bf16 MXU
    operands, f32 accumulation, f32 bias/ReLU) for a tight comparison.
    """
    (w1, b1, w2, b2, w3, b3, w4, b4, w5, b5) = params
    B = x.shape[0]
    cdt = compute_dtype
    f32 = jnp.float32

    def lin(a, w, b):
        return jnp.dot(a.astype(cdt), w.astype(cdt),
                       preferred_element_type=f32) + b

    def branch(xi):
        h = jax.nn.relu(lin(xi, w1, b1))
        h = jax.nn.relu(lin(h, w2, b2))
        h = jax.nn.relu(lin(h, w3, b3))
        return h

    u = branch(x[:, 0].reshape(B, 196))
    v = branch(x[:, 1].reshape(B, 196))
    w_cat = jnp.concatenate([u, v], axis=1)
    h = jax.nn.relu(lin(w_cat, w4, b4))
    return lin(h, w5, b5)


if __name__ == "__main__":
    key = jax.random.PRNGKey(0)
    kx, kx2, kp = jax.random.split(key, 3)
    params = init_params(kp)

    # (1) Small batch, single (full-array) tile, f32.
    B = 2
    x = jax.random.normal(kx, (B, 2, 14, 14), dtype=jnp.float32)
    out = jax.block_until_ready(mlp_ws_forward(x, params))
    ref = reference_forward(x, params)
    assert out.shape == (B, 2), out.shape
    assert jnp.allclose(out, ref, atol=1e-4, rtol=1e-4), (out, ref)

    # (2) Multi-tile grid + batch padding (B not a multiple of the tile), f32.
    B2 = 19
    x2 = jax.random.normal(kx2, (B2, 2, 14, 14), dtype=jnp.float32)
    out2 = jax.block_until_ready(mlp_ws_forward(x2, params, tb=8))
    ref2 = reference_forward(x2, params)
    assert out2.shape == (B2, 2), out2.shape
    assert jnp.allclose(out2, ref2, atol=1e-4, rtol=1e-4), (out2, ref2)

    # (3) bf16 MXU-operand fast path (f32 accumulate), multi-tile, even tiles.
    out3 = jax.block_until_ready(
        mlp_ws_forward(x2, params, tb=16, compute_dtype=jnp.bfloat16))
    ref3 = reference_forward(x2, params, compute_dtype=jnp.bfloat16)
    assert out3.shape == (B2, 2), out3.shape
    assert jnp.allclose(out3, ref3, atol=2e-3, rtol=2e-3), (out3, ref3)

    print("KERNEL_OK")
</pallas_src>

<mosaic_0001>
module attributes {stable_mosaic.version = 11 : i64} {
  func.func @_mlp_ws_kernel(%arg0: i32, %arg1: memref<2x392xf32, #tpu.memory_space<vmem>>, %arg2: memref<196x256xf32, #tpu.memory_space<vmem>>, %arg3: memref<256x128xf32, #tpu.memory_space<vmem>>, %arg4: memref<128x128xf32, #tpu.memory_space<vmem>>, %arg5: memref<256x128xf32, #tpu.memory_space<vmem>>, %arg6: memref<128x128xf32, #tpu.memory_space<vmem>>, %arg7: memref<1x768xf32, #tpu.memory_space<vmem>>, %arg8: memref<2x2xf32, #tpu.memory_space<vmem>>) attributes {dimension_semantics = [#tpu.dimension_semantics<parallel>], iteration_bounds = array<i64: 1>, scalar_prefetch = 0 : i64, scratch_operands = 0 : i64, tpu.core_type = #tpu.core_type<tc>, window_params = [{transform_indices = @transform_0, window_bounds = array<i64: 2, 392>}, {pipeline_mode = #tpu.pipeline_mode<synchronous>, transform_indices = @transform_1, window_bounds = array<i64: 196, 256>}, {pipeline_mode = #tpu.pipeline_mode<synchronous>, transform_indices = @transform_2, window_bounds = array<i64: 256, 128>}, {pipeline_mode = #tpu.pipeline_mode<synchronous>, transform_indices = @transform_3, window_bounds = array<i64: 128, 128>}, {pipeline_mode = #tpu.pipeline_mode<synchronous>, transform_indices = @transform_4, window_bounds = array<i64: 256, 128>}, {pipeline_mode = #tpu.pipeline_mode<synchronous>, transform_indices = @transform_5, window_bounds = array<i64: 128, 128>}, {pipeline_mode = #tpu.pipeline_mode<synchronous>, transform_indices = @transform_6, window_bounds = array<i64: 1, 768>}, {transform_indices = @transform_7, window_bounds = array<i64: 2, 2>}]} {
    %c0 = arith.constant 0 : index
    %c0_0 = arith.constant 0 : index
    %0 = vector.load %arg7[%c0, %c0_0] : memref<1x768xf32, #tpu.memory_space<vmem>>, vector<1x256xf32>
    %c0_1 = arith.constant 0 : index
    %c256 = arith.constant 256 : index
    %1 = vector.load %arg7[%c0_1, %c256] : memref<1x768xf32, #tpu.memory_space<vmem>>, vector<1x128xf32>
    %c0_2 = arith.constant 0 : index
    %c384 = arith.constant 384 : index
    %2 = vector.load %arg7[%c0_2, %c384] : memref<1x768xf32, #tpu.memory_space<vmem>>, vector<1x128xf32>
    %c0_3 = arith.constant 0 : index
    %c512 = arith.constant 512 : index
    %3 = vector.load %arg7[%c0_3, %c512] : memref<1x768xf32, #tpu.memory_space<vmem>>, vector<1x128xf32>
    %c0_4 = arith.constant 0 : index
    %c640 = arith.constant 640 : index
    %4 = vector.load %arg7[%c0_4, %c640] : memref<1x768xf32, #tpu.memory_space<vmem>>, vector<1x128xf32>
    %c0_5 = arith.constant 0 : index
    %c0_6 = arith.constant 0 : index
    %5 = vector.load %arg1[%c0_5, %c0_6] : memref<2x392xf32, #tpu.memory_space<vmem>>, vector<2x392xf32>
    %6 = vector.extract_strided_slice %5 {offsets = [0, 0], sizes = [2, 196], strides = [1, 1]} : vector<2x392xf32> to vector<2x196xf32>
    %7 = vector.extract_strided_slice %5 {offsets = [0, 196], sizes = [2, 196], strides = [1, 1]} : vector<2x392xf32> to vector<2x196xf32>
    %c0_7 = arith.constant 0 : index
    %c0_8 = arith.constant 0 : index
    %8 = vector.load %arg2[%c0_7, %c0_8] : memref<196x256xf32, #tpu.memory_space<vmem>>, vector<196x256xf32>
    %cst = arith.constant dense<0.000000e+00> : vector<2x256xf32>
    %9 = tpu.matmul %6, %8, %cst {dimension_numbers = #tpu.dot_dimension_numbers<[1], [0], [0], [1], [0, 0, 1, 1], [], []>} : vector<2x196xf32>, vector<196x256xf32>, vector<2x256xf32> -> vector<2x256xf32>
    %10 = vector.broadcast %0 : vector<1x256xf32> to vector<2x256xf32>
    %11 = arith.addf %9, %10 : vector<2x256xf32>
    %cst_9 = arith.constant 0.000000e+00 : f32
    %12 = vector.broadcast %cst_9 : f32 to vector<2x256xf32>
    %13 = arith.maximumf %11, %12 : vector<2x256xf32>
    %c0_10 = arith.constant 0 : index
    %c0_11 = arith.constant 0 : index
    %14 = vector.load %arg3[%c0_10, %c0_11] : memref<256x128xf32, #tpu.memory_space<vmem>>, vector<256x128xf32>
    %cst_12 = arith.constant dense<0.000000e+00> : vector<2x128xf32>
    %15 = tpu.matmul %13, %14, %cst_12 {dimension_numbers = #tpu.dot_dimension_numbers<[1], [0], [0], [1], [0, 0, 1, 1], [], []>} : vector<2x256xf32>, vector<256x128xf32>, vector<2x128xf32> -> vector<2x128xf32>
    %16 = vector.broadcast %1 : vector<1x128xf32> to vector<2x128xf32>
    %17 = arith.addf %15, %16 : vector<2x128xf32>
    %cst_13 = arith.constant 0.000000e+00 : f32
    %18 = vector.broadcast %cst_13 : f32 to vector<2x128xf32>
    %19 = arith.maximumf %17, %18 : vector<2x128xf32>
    %c0_14 = arith.constant 0 : index
    %c0_15 = arith.constant 0 : index
    %20 = vector.load %arg4[%c0_14, %c0_15] : memref<128x128xf32, #tpu.memory_space<vmem>>, vector<128x128xf32>
    %cst_16 = arith.constant dense<0.000000e+00> : vector<2x128xf32>
    %21 = tpu.matmul %19, %20, %cst_16 {dimension_numbers = #tpu.dot_dimension_numbers<[1], [0], [0], [1], [0, 0, 1, 1], [], []>} : vector<2x128xf32>, vector<128x128xf32>, vector<2x128xf32> -> vector<2x128xf32>
    %22 = vector.broadcast %2 : vector<1x128xf32> to vector<2x128xf32>
    %23 = arith.addf %21, %22 : vector<2x128xf32>
    %cst_17 = arith.constant 0.000000e+00 : f32
    %24 = vector.broadcast %cst_17 : f32 to vector<2x128xf32>
    %25 = arith.maximumf %23, %24 : vector<2x128xf32>
    %c0_18 = arith.constant 0 : index
    %c0_19 = arith.constant 0 : index
    %26 = vector.load %arg2[%c0_18, %c0_19] : memref<196x256xf32, #tpu.memory_space<vmem>>, vector<196x256xf32>
    %cst_20 = arith.constant dense<0.000000e+00> : vector<2x256xf32>
    %27 = tpu.matmul %7, %26, %cst_20 {dimension_numbers = #tpu.dot_dimension_numbers<[1], [0], [0], [1], [0, 0, 1, 1], [], []>} : vector<2x196xf32>, vector<196x256xf32>, vector<2x256xf32> -> vector<2x256xf32>
    %28 = vector.broadcast %0 : vector<1x256xf32> to vector<2x256xf32>
    %29 = arith.addf %27, %28 : vector<2x256xf32>
    %cst_21 = arith.constant 0.000000e+00 : f32
    %30 = vector.broadcast %cst_21 : f32 to vector<2x256xf32>
    %31 = arith.maximumf %29, %30 : vector<2x256xf32>
    %c0_22 = arith.constant 0 : index
    %c0_23 = arith.constant 0 : index
    %32 = vector.load %arg3[%c0_22, %c0_23] : memref<256x128xf32, #tpu.memory_space<vmem>>, vector<256x128xf32>
    %cst_24 = arith.constant dense<0.000000e+00> : vector<2x128xf32>
    %33 = tpu.matmul %31, %32, %cst_24 {dimension_numbers = #tpu.dot_dimension_numbers<[1], [0], [0], [1], [0, 0, 1, 1], [], []>} : vector<2x256xf32>, vector<256x128xf32>, vector<2x128xf32> -> vector<2x128xf32>
    %34 = vector.broadcast %1 : vector<1x128xf32> to vector<2x128xf32>
    %35 = arith.addf %33, %34 : vector<2x128xf32>
    %cst_25 = arith.constant 0.000000e+00 : f32
    %36 = vector.broadcast %cst_25 : f32 to vector<2x128xf32>
    %37 = arith.maximumf %35, %36 : vector<2x128xf32>
    %c0_26 = arith.constant 0 : index
    %c0_27 = arith.constant 0 : index
    %38 = vector.load %arg4[%c0_26, %c0_27] : memref<128x128xf32, #tpu.memory_space<vmem>>, vector<128x128xf32>
    %cst_28 = arith.constant dense<0.000000e+00> : vector<2x128xf32>
    %39 = tpu.matmul %37, %38, %cst_28 {dimension_numbers = #tpu.dot_dimension_numbers<[1], [0], [0], [1], [0, 0, 1, 1], [], []>} : vector<2x128xf32>, vector<128x128xf32>, vector<2x128xf32> -> vector<2x128xf32>
    %40 = vector.broadcast %2 : vector<1x128xf32> to vector<2x128xf32>
    %41 = arith.addf %39, %40 : vector<2x128xf32>
    %cst_29 = arith.constant 0.000000e+00 : f32
    %42 = vector.broadcast %cst_29 : f32 to vector<2x128xf32>
    %43 = arith.maximumf %41, %42 : vector<2x128xf32>
    %c0_30 = arith.constant 0 : index
    %c0_31 = arith.constant 0 : index
    %44 = vector.load %arg5[%c0_30, %c0_31] : memref<256x128xf32, #tpu.memory_space<vmem>>, vector<128x128xf32>
    %cst_32 = arith.constant dense<0.000000e+00> : vector<2x128xf32>
    %45 = tpu.matmul %25, %44, %cst_32 {dimension_numbers = #tpu.dot_dimension_numbers<[1], [0], [0], [1], [0, 0, 1, 1], [], []>} : vector<2x128xf32>, vector<128x128xf32>, vector<2x128xf32> -> vector<2x128xf32>
    %c128 = arith.constant 128 : index
    %c0_33 = arith.constant 0 : index
    %46 = vector.load %arg5[%c128, %c0_33] : memref<256x128xf32, #tpu.memory_space<vmem>>, vector<128x128xf32>
    %cst_34 = arith.constant dense<0.000000e+00> : vector<2x128xf32>
    %47 = tpu.matmul %43, %46, %cst_34 {dimension_numbers = #tpu.dot_dimension_numbers<[1], [0], [0], [1], [0, 0, 1, 1], [], []>} : vector<2x128xf32>, vector<128x128xf32>, vector<2x128xf32> -> vector<2x128xf32>
    %48 = arith.addf %45, %47 : vector<2x128xf32>
    %49 = vector.broadcast %3 : vector<1x128xf32> to vector<2x128xf32>
    %50 = arith.addf %48, %49 : vector<2x128xf32>
    %cst_35 = arith.constant 0.000000e+00 : f32
    %51 = vector.broadcast %cst_35 : f32 to vector<2x128xf32>
    %52 = arith.maximumf %50, %51 : vector<2x128xf32>
    %c0_36 = arith.constant 0 : index
    %c0_37 = arith.constant 0 : index
    %53 = vector.load %arg6[%c0_36, %c0_37] : memref<128x128xf32, #tpu.memory_space<vmem>>, vector<128x128xf32>
    %cst_38 = arith.constant dense<0.000000e+00> : vector<2x128xf32>
    %54 = tpu.matmul %52, %53, %cst_38 {dimension_numbers = #tpu.dot_dimension_numbers<[1], [0], [0], [1], [0, 0, 1, 1], [], []>} : vector<2x128xf32>, vector<128x128xf32>, vector<2x128xf32> -> vector<2x128xf32>
    %55 = vector.broadcast %4 : vector<1x128xf32> to vector<2x128xf32>
    %56 = arith.addf %54, %55 : vector<2x128xf32>
    %57 = vector.extract_strided_slice %56 {offsets = [0, 0], sizes = [2, 2], strides = [1, 1]} : vector<2x128xf32> to vector<2x2xf32>
    %c0_39 = arith.constant 0 : index
    %c0_40 = arith.constant 0 : index
    %58 = vector.load %arg8[%c0_39, %c0_40] : memref<2x2xf32, #tpu.memory_space<vmem>>, vector<2x2xf32>
    tpu.vector_store %arg8[%c0_39, %c0_40], %57 {strides = array<i32>} : memref<2x2xf32, #tpu.memory_space<vmem>>, vector<2x2xf32>,
    return
  }
  func.func @transform_0(%arg0: i32) -> (i32, i32) {
    %c0_i32 = arith.constant 0 : i32
    %c0_i32_0 = arith.constant 0 : i32
    return %arg0, %c0_i32 : i32, i32
  }
  func.func @transform_1(%arg0: i32) -> (i32, i32) {
    %c0_i32 = arith.constant 0 : i32
    %c0_i32_0 = arith.constant 0 : i32
    %c0_i32_1 = arith.constant 0 : i32
    return %c0_i32, %c0_i32_0 : i32, i32
  }
  func.func @transform_2(%arg0: i32) -> (i32, i32) {
    %c0_i32 = arith.constant 0 : i32
    %c0_i32_0 = arith.constant 0 : i32
    %c0_i32_1 = arith.constant 0 : i32
    return %c0_i32, %c0_i32_0 : i32, i32
  }
  func.func @transform_3(%arg0: i32) -> (i32, i32) {
    %c0_i32 = arith.constant 0 : i32
    %c0_i32_0 = arith.constant 0 : i32
    %c0_i32_1 = arith.constant 0 : i32
    return %c0_i32, %c0_i32_0 : i32, i32
  }
  func.func @transform_4(%arg0: i32) -> (i32, i32) {
    %c0_i32 = arith.constant 0 : i32
    %c0_i32_0 = arith.constant 0 : i32
    %c0_i32_1 = arith.constant 0 : i32
    return %c0_i32, %c0_i32_0 : i32, i32
  }
  func.func @transform_5(%arg0: i32) -> (i32, i32) {
    %c0_i32 = arith.constant 0 : i32
    %c0_i32_0 = arith.constant 0 : i32
    %c0_i32_1 = arith.constant 0 : i32
    return %c0_i32, %c0_i32_0 : i32, i32
  }
  func.func @transform_6(%arg0: i32) -> (i32, i32) {
    %c0_i32 = arith.constant 0 : i32
    %c0_i32_0 = arith.constant 0 : i32
    %c0_i32_1 = arith.constant 0 : i32
    return %c0_i32, %c0_i32_0 : i32, i32
  }
  func.func @transform_7(%arg0: i32) -> (i32, i32) {
    %c0_i32 = arith.constant 0 : i32
    %c0_i32_0 = arith.constant 0 : i32
    return %arg0, %c0_i32 : i32, i32
  }
}

</mosaic_0001>

<bundles_post_ra>
// kernel: tpu_custom_call.1
= control target key start
LH: loop header
LB: loop body
LE: loop exit
PB: predicated region body
PF: predicated region fallthrough
CT: control target
= control target key end

     0   :  { %12 = vsyncpa [#allocation3], 0  ;;  %s2096_s0 = inlined_call_operand.hbm [shape: f32[2,392], index: 0, kind: input, shape index: {}]   ;;  %s2097_s1 = inlined_call_operand.hbm [shape: f32[196,256], index: 1, kind: input, shape index: {}]   ;;  %s2098_s2 = inlined_call_operand.hbm [shape: f32[256,128], index: 2, kind: input, shape index: {}]   ;;  %s2099_s3 = inlined_call_operand.hbm [shape: f32[128,128], index: 3, kind: input, shape index: {}]   ;;  %s2100_s4 = inlined_call_operand.hbm [shape: f32[256,128], index: 4, kind: input, shape index: {}]   ;;  %s2101_s5 = inlined_call_operand.hbm [shape: f32[128,128], index: 5, kind: input, shape index: {}]   ;;  %s2102_s6 = inlined_call_operand.vmem [shape: f32[1,768], index: 6, kind: input, shape index: {}]   ;;  %s2103_s7 = inlined_call_operand.hbm [shape: f32[2,2], index: 7, kind: output, shape index: {}]  }
   0x1   :  { %13 = vsyncpa [#allocation6], 0 }
   0x2   :  { %14 = vsyncpa [#allocation9], 0 }
   0x3   :  { %15 = vsyncpa [#allocation12], 0 }
   0x4   :  { %16 = vsyncpa [#allocation4], 0  ;;  %s1503_s24 = smov [#allocation5]  }
   0x5   :  { %s32_s25 = sshll.u32 %s1503_s24, 4  ;;  %s33_s25 = int_to_ptr.vmem [resolvable:$true] %s32_s25 }
   0x6   :  { %s1361_s26 = scalar_lea.vmem %s33_s25, 6400  ;;  %p1366_p1 = scmp.lt.s32.totalorder %s33_s25, %s33_s25 }
   0x7   :  { %p1362_p0 = scmp.ne.s32.totalorder %s33_s25, %s1361_s26  ;;  %p1367_p2 = scmp.lt.s32.totalorder %s1361_s26, %s1361_s26 }
   0x9   :  { %p1368_p3 = por %p1367_p2, %p1366_p1 }
   0xb   :  { %p1369_p4 = pnand %p1368_p3, %p1362_p0 }
   0xd   :  { %1372 = shalt.err (!%p1369_p4)
}
   0xe   :  { %s1504_s27 = smov 256   ;;  %s1505_s28 = smov 16  }
   0xf   :  { %38 = dma.hbm_to_vmem [thread:$0]  %s2097_s1, 6400, %s33_s25, [#allocation6], %s1504_s27, %s1504_s27, %s1505_s28  }
  0x10   :  { %s1506_s8 = smov [#allocation8]   ;;  %s1507_s10 = smov [#allocation2]  }
  0x11   :  { %s56_s9 = sshll.u32 %s1506_s8, 4  ;;  %s23_s11 = sshll.u32 %s1507_s10, 4  ;;  %s57_s9 = int_to_ptr.vmem [resolvable:$true] %s56_s9  ;;  %s24_s11 = int_to_ptr.vmem [resolvable:$true] %s23_s11 }
  0x12   :  { %s1381_s12 = scalar_lea.vmem %s57_s9, 2048  ;;  %p1386_p6 = scmp.lt.s32.totalorder %s57_s9, %s57_s9 }
  0x13   :  { %p1382_p5 = scmp.ne.s32.totalorder %s57_s9, %s1381_s12  ;;  %p1387_p7 = scmp.lt.s32.totalorder %s1381_s12, %s1381_s12 }
  0x15   :  { %p1388_p8 = por %p1387_p7, %p1386_p6 }
  0x17   :  { %p1389_p9 = pnand %p1388_p8, %p1382_p5 }
  0x19   :  { %1392 = shalt.err (!%p1389_p9)
}
  0x1a   :  { %s1508_s13 = smov 128   ;;  %s1509_s14 = smov 8  }
  0x1b   :  { %62 = dma.hbm_to_vmem [thread:$0]  %s2099_s3, 2048, %s57_s9, [#allocation9], %s1508_s13, %s1508_s13, %s1509_s14  }
  0x1c   :  { %s1401_s1 = scalar_lea.vmem %s24_s11, 128  ;;  %p1406_p11 = scmp.lt.s32.totalorder %s24_s11, %s24_s11 }
  0x1d   :  { %p1402_p10 = scmp.ne.s32.totalorder %s24_s11, %s1401_s1  ;;  %p1407_p12 = scmp.lt.s32.totalorder %s1401_s1, %s1401_s1 }
  0x1f   :  { %p1408_p13 = por %p1407_p12, %p1406_p11 }
  0x21   :  { %p1409_p0 = pnand %p1408_p13, %p1402_p10 }
  0x23   :  { %1412 = shalt.err (!%p1409_p0)
}
  0x24   :  { %26 = dma.hbm_to_vmem [thread:$0]  %s2096_s0, 128, %s24_s11, [#allocation3]  }
  0x25   :  { %s1510_s19 = smov [#allocation7]   ;;  %s1511_s21 = smov [#allocation10]  }
  0x26   :  { %s44_s20 = sshll.u32 %s1510_s19, 4  ;;  %s68_s22 = sshll.u32 %s1511_s21, 4  ;;  %s45_s20 = int_to_ptr.vmem [resolvable:$true] %s44_s20  ;;  %s69_s22 = int_to_ptr.vmem [resolvable:$true] %s68_s22 }
  0x27   :  { %s1421_s23 = scalar_lea.vmem %s45_s20, 4096  ;;  %p1426_p2 = scmp.lt.s32.totalorder %s45_s20, %s45_s20 }
  0x28   :  { %p1422_p1 = scmp.ne.s32.totalorder %s45_s20, %s1421_s23  ;;  %p1427_p3 = scmp.lt.s32.totalorder %s1421_s23, %s1421_s23 }
  0x2a   :  { %p1428_p4 = por %p1427_p3, %p1426_p2 }
  0x2c   :  { %p1429_p5 = pnand %p1428_p4, %p1422_p1 }
  0x2e   :  { %1432 = shalt.err (!%p1429_p5)
}
  0x2f   :  { %50 = dma.hbm_to_vmem [thread:$0]  %s2098_s2, 4096, %s45_s20, [#allocation6], %s1508_s13, %s1508_s13, %s1509_s14  }
  0x30   :  { %s1441_s0 = scalar_lea.vmem %s69_s22, 4096  ;;  %p1446_p7 = scmp.lt.s32.totalorder %s69_s22, %s69_s22 }
  0x31   :  { %p1442_p6 = scmp.ne.s32.totalorder %s69_s22, %s1441_s0  ;;  %p1447_p8 = scmp.lt.s32.totalorder %s1441_s0, %s1441_s0 }
  0x33   :  { %p1448_p9 = por %p1447_p8, %p1446_p7 }
  0x35   :  { %p1449_p10 = pnand %p1448_p9, %p1442_p6 }
  0x37   :  { %1452 = shalt.err (!%p1449_p10)
}
  0x38   :  { %74 = dma.hbm_to_vmem [thread:$0]  %s2100_s4, 4096, %s69_s22, [#allocation9], %s1508_s13, %s1508_s13, %s1509_s14  }
  0x39   :  { %s1512_s27 = smov [#allocation11]  }
  0x3a   :  { %s80_s28 = sshll.u32 %s1512_s27, 4  ;;  %s81_s28 = int_to_ptr.vmem [resolvable:$true] %s80_s28 }
  0x3b   :  { %s1461_s29 = scalar_lea.vmem %s81_s28, 2048  ;;  %p1466_p12 = scmp.lt.s32.totalorder %s81_s28, %s81_s28 }
  0x3c   :  { %p1462_p11 = scmp.ne.s32.totalorder %s81_s28, %s1461_s29  ;;  %p1467_p13 = scmp.lt.s32.totalorder %s1461_s29, %s1461_s29 }
  0x3e   :  { %p1468_p0 = por %p1467_p13, %p1466_p12 }
  0x40   :  { %p1469_p1 = pnand %p1468_p0, %p1462_p11 }
  0x42   :  { %1472 = shalt.err (!%p1469_p1)
}
  0x43   :  { %86 = dma.hbm_to_vmem [thread:$0]  %s2101_s5, 2048, %s81_s28, [#allocation12], %s1508_s13, %s1508_s13, %s1509_s14  }
  0x44   :  { %1493 = dma.done.wait [#allocation3], 128  }
  0x45   :  { %1494 = vsyncadd [#allocation3], 4294967168 }
  0x46   :  { %1495 = dma.done.wait [#allocation6], 10496  }
  0x47   :  { %1496 = vsyncadd [#allocation6], 4294956800 }
  0x48   :  { %1497 = dma.done.wait [#allocation9], 6144  }
  0x49   :  { %1498 = vsyncadd [#allocation9], 4294961152 }
  0x4a   :  { %1499 = dma.done.wait [#allocation12], 2048  }
  0x4b   :  { %1500 = vsyncadd [#allocation12], 4294965248  ;;  %v1588_v0 = vld [vmem:[#allocation5 + $0xf8] sm:$0xff]  ;;  %v1590_v1 = vld [vmem:[#allocation5 + $0xf0] sm:$0xff]  ;;  %v164_v8 = vlaneseq  ;;  %v1513_v9 = vmov 1983009808  }
  0x4c   :  { %v1592_v2 = vld [vmem:[#allocation5 + $0xe8] sm:$0xff]  ;;  %194 = vmatprep.subr.mxu0 %v1588_v0  ;;  %v1595_v3 = vld [vmem:[#allocation5 + $0xe0] sm:$0xff]  ;;  %v1598_v4 = vld [vmem:[#allocation5 + $0xd8] sm:$0xff]  ;;  %v176_v10 = vunpack.c.l.s4 %v1513_v9  ;;  %vm184_vm0 = vcmask 556032   ;;  %s1514_s4 = smov 60   ;;  %vm187_vm1 = vcmask 1043456  }
  0x4d   :  { %195 = vmatpush1.msra.mxu0 %v1590_v1  ;;  %v1601_v5 = vld [vmem:[#allocation5 + $0xd0] sm:$0xff]  ;;  %v1604_v6 = vld [vmem:[#allocation5 + $0xc8] sm:$0xff]  ;;  %v1607_v7 = vld [vmem:[#allocation5 + $0xc0] sm:$0xff]  ;;  %v1621_v15 = vshrl.u32 %v164_v8, 7  ;;  %vm484_vm2 = vcmask 490496   ;;  %vm1516_vm3 = vmmov 0  }
  0x4e   :  { %196 = vmatprep.subr.mxu0 %v1592_v2  ;;  %v1610_v11 = vld [vmem:[#allocation5 + $0xb8] sm:$0xff]  ;;  %v1613_v12 = vld [vmem:[#allocation5 + $0xb0] sm:$0xff]  ;;  %v1616_v13 = vld [vmem:[#allocation5 + $0xa8] sm:$0xff]  ;;  %v177_v16 = vunpack.c.0.s8 %v176_v10  ;;  %s1517_s1 = smov [#allocation13]   ;;  %vm977_vm4 = vcmask 9216  }
  0x4f   :  { %197 = vmatpush1.msra.mxu0 %v1595_v3  ;;  %v1619_v14 = vld [vmem:[#allocation5 + $0xa0] sm:$0xff]  ;;  %v1624_v17 = vld [vmem:[#allocation5 + $0x98] sm:$0xff]  ;;  %v1627_v18 = vld [vmem:[#allocation5 + $0x90] sm:$0xff]  ;;  %s985_s17 = sshll.u32 %s1517_s1, 4  ;;  %s986_s17 = int_to_ptr.vmem [resolvable:$true] %s985_s17 }
  0x50   :  { %198 = vmatprep.subr.mxu0 %v1598_v4  ;;  %v1630_v19 = vld [vmem:[#allocation5 + $0x88] sm:$0xff]  ;;  %v1633_v20 = vld [vmem:[#allocation5 + $0x80] sm:$0xff]  ;;  %v180_v21 = vsub.s32 %v177_v16, %v1621_v15  ;;  %v1637_v22 = vld [vmem:[#allocation5 + $0x78] sm:$0xff]  ;;  %s1473_s18 = scalar_lea.vmem %s986_s17, 32  ;;  %p1478_p3 = scmp.lt.s32.totalorder %s986_s17, %s986_s17 }
  0x51   :  { %199 = vmatpush1.msra.mxu0 %v1601_v5  ;;  %v1640_v23 = vld [vmem:[#allocation5 + $0x70] sm:$0xff]  ;;  %v1643_v24 = vld [vmem:[#allocation5 + $0x68] sm:$0xff]  ;;  %v1645_v25 = vld [vmem:[#allocation5 + $0x60] sm:$0xff]  ;;  %p1474_p2 = scmp.ne.s32.totalorder %s986_s17, %s1473_s18  ;;  %p1479_p4 = scmp.lt.s32.totalorder %s1473_s18, %s1473_s18 }
  0x52   :  { %200 = vmatprep.subr.mxu0 %v1604_v6  ;;  %v112_v26 = vld [vmem:[#allocation2] sm:$0xff]  ;;  %v1650_v29 = vld [vmem:[#allocation7 + $0xf8] sm:$0xff]  ;;  %v1654_v31 = vld [vmem:[#allocation7 + $0xf0] sm:$0xff] }
  0x53   :  { %201 = vmatpush1.msra.mxu0 %v1607_v7  ;;  %v1648_v27 = vrot.slane %v112_v26, %v180_v21  ;;  %v469_v28 = vcombine.high %v112_v26, %v112_v26  ;;  %v1652_v30 = vld [vmem:[#allocation7 + $0x78] sm:$0xff]  ;;  %v1657_v32 = vld [vmem:[#allocation5 + $0x58] sm:$0xff]  ;;  %1007 = vmatprep.subr.mxu1 %v1650_v29  ;;  %v1661_v33 = vld [vmem:[#allocation5 + $0x50] sm:$0xff]  ;;  %p1480_p5 = por %p1479_p4, %p1478_p3 }
  0x54   :  { %202 = vmatprep.subr.mxu0 %v1610_v11  ;;  %1008 = vmatpush3.msra.mxu1 %v1652_v30  ;;  %v1667_v36 = vld [vmem:[#allocation5 + $0x48] sm:$0xff]  ;;  %v1671_v37 = vld [vmem:[#allocation5 + $0x40] sm:$0xff]  ;;  %v1677_v39 = vld [vmem:[#allocation5 + $0x38] sm:$0xff] }
  0x55   :  { %203 = vmatpush1.msra.mxu0 %v1613_v12  ;;  %v182_v34 = vcombine.high %v1648_v27, %v1648_v27  ;;  %v476_v35 = vrot.slane %v469_v28, %v180_v21  ;;  %1009 = vmatprep.subr.mxu1 %v1654_v31  ;;  %v1674_v38 = vld [vmem:[#allocation7 + $0x70] sm:$0xff]  ;;  %v1679_v41 = vld [vmem:[#allocation7 + $0xe8] sm:$0xff]  ;;  %v1682_v42 = vld [vmem:[#allocation5 + $0x30] sm:$0xff]  ;;  %p1481_p6 = pnand %p1480_p5, %p1474_p2 }
  0x56   :  { %204 = vmatprep.subr.mxu0 %v1616_v13  ;;  %v1685_v43 = vld [vmem:[#allocation5 + $0x28] sm:$0xff]  ;;  %1010 = vmatpush3.msra.mxu1 %v1674_v38  ;;  %v1688_v44 = vld [vmem:[#allocation7 + $0x68] sm:$0xff]  ;;  %v1691_v45 = vld [vmem:[#allocation5 + $0x20] sm:$0xff] }
  0x57   :  { %205 = vmatpush1.msra.mxu0 %v1619_v14  ;;  %999 = vmatprep.mubr.msk.f32.mxu0 %vm184_vm0, %v182_v34  ;;  %v477_v40 = vcombine.high %v476_v35, %v476_v35  ;;  %v1694_v46 = vld [vmem:[#allocation7 + $0xe0] sm:$0xff]  ;;  %v1697_v47 = vld [vmem:[#allocation5 + $0x18] sm:$0xff]  ;;  %v1705_v50 = vld [vmem:[#allocation7 + $0xd8] sm:$0xff] }
  0x58   :  { %206 = vmatprep.subr.mxu0 %v1624_v17  ;;  %480 = vrot.lane.b32.xlu0 %v476_v35, %s1514_s4  ;;  %v1699_v48 = vld [vmem:[#allocation7 + $0x60] sm:$0xff]  ;;  %v1708_v51 = vld [vmem:[#allocation5 + $0x8] sm:$0xff]  ;;  %v1714_v53 = vld [vmem:[#allocation5] sm:$0xff] }
  0x59   :  { %207 = vmatpush1.msra.mxu0 %v1627_v18  ;;  %478 = vrot.lane.b32.xlu1 %v182_v34, %s1514_s4  ;;  %v1702_v49 = vld [vmem:[#allocation5 + $0x10] sm:$0xff]  ;;  %v1711_v52 = vld [vmem:[#allocation7 + $0x58] sm:$0xff]  ;;  %v1717_v54 = vld [vmem:[#allocation7 + $0xd0] sm:$0xff] }
  0x5a   :  { %208 = vmatprep.subr.mxu0 %v1630_v19  ;;  %1011 = vmatprep.subr.mxu1 %v1679_v41  ;;  %2116 = vst [vmem:[#allocation19_spill] sm:$0xff] %v1711_v52  ;;  %2117 = vst [vmem:[#allocation20_spill] sm:$0xff] %v1717_v54  ;;  %v1720_v55 = vld [vmem:[#allocation5 + $0x188] sm:$0xf]  ;;  %v1723_v56 = vld [vmem:[#allocation7 + $0x50] sm:$0xff] }
  0x5b   :  { %209 = vmatpush1.msra.mxu0 %v1633_v20  ;;  %1012 = vmatpush3.msra.mxu1 %v1688_v44  ;;  %2118 = vst [vmem:[#allocation21_spill] sm:$0xff] %v1723_v56  ;;  %v1726_v57 = vld [vmem:[#allocation5 + $0x180] sm:$0xf]  ;;  %v1729_v58 = vld [vmem:[#allocation7 + $0xc8] sm:$0xff]  ;;  %v1739_v61 = vld [vmem:[#allocation5 + $0x170] sm:$0xff] }
  0x5c   :  { %210 = vmatprep.subr.mxu0 %v1637_v22  ;;  %482 = vrot.lane.b32.xlu0 %v477_v40, %s1514_s4  ;;  %2119 = vst [vmem:[#allocation22_spill] sm:$0xff] %v1729_v58  ;;  %v1732_v59 = vld [vmem:[#allocation5 + $0x178] sm:$0xff]  ;;  %v1742_v62 = vld [vmem:[#allocation7 + $0xc0] sm:$0xff]  ;;  %v1746_v63 = vld [vmem:[#allocation5 + $0x168] sm:$0xff] }
  0x5d   :  { %211 = vmatpush1.msra.mxu0 %v1640_v23  ;;  %1013 = vmatprep.subr.mxu1 %v1694_v46  ;;  %v1735_v60 = vld [vmem:[#allocation7 + $0x48] sm:$0xff]  ;;  %2121 = vst [vmem:[#allocation24_spill] sm:$0xff] %v1742_v62  ;;  %v1749_v8 = vld [vmem:[#allocation7 + $0x40] sm:$0xff]  ;;  %v1752_v9 = vld [vmem:[#allocation5 + $0x160] sm:$0xff] }
  0x5e   :  { %212 = vmatprep.subr.mxu0 %v1643_v24  ;;  %1014 = vmatpush3.msra.mxu1 %v1699_v48  ;;  %2120 = vst [vmem:[#allocation23_spill] sm:$0xff] %v1735_v60  ;;  %2122 = vst [vmem:[#allocation25_spill] sm:$0xff] %v1749_v8  ;;  %v1755_v10 = vld [vmem:[#allocation7 + $0xb8] sm:$0xff]  ;;  %v1758_v16 = vld [vmem:[#allocation5 + $0x158] sm:$0xff] }
  0x5f   :  { %213 = vmatpush1.msra.mxu0 %v1645_v25  ;;  %1015 = vmatprep.subr.mxu1 %v1705_v50  ;;  %2123 = vst [vmem:[#allocation26_spill] sm:$0xff] %v1755_v10  ;;  %v1761_v21 = vld [vmem:[#allocation7 + $0x38] sm:$0xff]  ;;  %v1764_v26 = vld [vmem:[#allocation5 + $0x150] sm:$0xff]  ;;  %v1767_v28 = vld [vmem:[#allocation7 + $0xb0] sm:$0xff] }
  0x60   :  { %214 = vmatprep.subr.mxu0 %v1657_v32  ;;  %1016 = vmatpush3.msra.mxu1 %v1711_v52  ;;  %2124 = vst [vmem:[#allocation27_spill] sm:$0xff] %v1761_v21  ;;  %2125 = vst [vmem:[#allocation28_spill] sm:$0xff] %v1767_v28  ;;  %v1770_v34 = vld [vmem:[#allocation5 + $0x148] sm:$0xff]  ;;  %v1773_v35 = vld [vmem:[#allocation7 + $0x30] sm:$0xff] }
  0x61   :  { %215 = vmatpush1.msra.mxu0 %v1661_v33  ;;  %1017 = vmatprep.subr.mxu1 %v1717_v54  ;;  %2126 = vst [vmem:[#allocation29_spill] sm:$0xff] %v1773_v35  ;;  %v1776_v40 = vld [vmem:[#allocation5 + $0x140] sm:$0xff]  ;;  %v148_v54 = vld [vmem:[#allocation5 + $0x118] sm:$0xff]  ;;  %v146_v52 = vld [vmem:[#allocation5 + $0x108] sm:$0xff] }
  0x62   :  { %216 = vmatprep.subr.mxu0 %v1667_v36  ;;  %1018 = vmatpush3.msra.mxu1 %v1723_v56  ;;  %v1797_v56 = vld [vmem:[#allocation7 + $0x20] sm:$0xff] }
  0x63   :  { %217 = vmatpush1.msra.mxu0 %v1671_v37  ;;  %1019 = vmatprep.subr.mxu1 %v1729_v58  ;;  %v1791_v58 = vld [vmem:[#allocation7 + $0xa0] sm:$0xff] }
  0x64   :  { %218 = vmatprep.subr.mxu0 %v1677_v39  ;;  %1020 = vmatpush3.msra.mxu1 %v1735_v60  ;;  %v1785_v60 = vld [vmem:[#allocation7 + $0x28] sm:$0xff] }
  0x65   :  { %219 = vmatpush1.msra.mxu0 %v1682_v42  ;;  %1021 = vmatprep.subr.mxu1 %v1742_v62  ;;  %v1779_v62 = vld [vmem:[#allocation7 + $0xa8] sm:$0xff] }
  0x66   :  { %220 = vmatprep.subr.mxu0 %v1685_v43  ;;  %1022 = vmatpush3.msra.mxu1 %v1749_v8  ;;  %2127 = vst [vmem:[#allocation30_spill] sm:$0xff] %v1779_v62  ;;  %v1782_v8 = vld [vmem:[#allocation5 + $0x138] sm:$0xff] }
  0x67   :  { %221 = vmatpush1.msra.mxu0 %v1691_v45  ;;  %1023 = vmatprep.subr.mxu1 %v1755_v10  ;;  %v1788_v10 = vld [vmem:[#allocation5 + $0x130] sm:$0xff] }
  0x68   :  { %222 = vmatprep.subr.mxu0 %v1697_v47  ;;  %1024 = vmatpush3.msra.mxu1 %v1761_v21  ;;  %v1794_v21 = vld [vmem:[#allocation5 + $0x128] sm:$0xff] }
  0x69   :  { %223 = vmatpush1.msra.mxu0 %v1702_v49  ;;  %1025 = vmatprep.subr.mxu1 %v1767_v28  ;;  %v149_v28 = vld [vmem:[#allocation5 + $0x120] sm:$0xff] }
  0x6a   :  { %224 = vmatprep.subr.mxu0 %v1708_v51  ;;  %1026 = vmatpush3.msra.mxu1 %v1773_v35  ;;  %v147_v35 = vld [vmem:[#allocation5 + $0x110] sm:$0xff] }
  0x6b   :  { %225 = vmatpush1.msra.mxu0 %v1714_v53  ;;  %1027 = vmatprep.subr.mxu1 %v1779_v62  ;;  %v145_v62 = vld [vmem:[#allocation5 + $0x100] sm:$0xff] }
  0x6c   :  { %997 = vmatprep.subr.msk.mxu0 %vm187_vm1, %v1720_v55  ;;  %1028 = vmatpush3.msra.mxu1 %v1785_v60 }
  0x6d   :  { %998 = vmatpush2.msk.msra.mxu0 %vm187_vm1, %v1726_v57  ;;  %1029 = vmatprep.subr.mxu1 %v1791_v58 }
  0x6e   :  { %242 = vmatprep.subr.mxu0 %v1732_v59  ;;  %1030 = vmatpush3.msra.mxu1 %v1797_v56 }
  0x6f   :  { %243 = vmatpush2.msra.mxu0 %v1739_v61 }
  0x70   :  { %244 = vmatprep.subr.mxu0 %v1746_v63 }
  0x71   :  { %245 = vmatpush2.msra.mxu0 %v1752_v9 }
  0x72   :  { %246 = vmatprep.subr.mxu0 %v1758_v16 }
  0x73   :  { %247 = vmatpush2.msra.mxu0 %v1764_v26 }
  0x74   :  { %248 = vmatprep.subr.mxu0 %v1770_v34 }
  0x75   :  { %249 = vmatpush2.msra.mxu0 %v1776_v40 }
  0x76   :  { %250 = vmatprep.subr.mxu0 %v1782_v8 }
  0x77   :  { %251 = vmatpush2.msra.mxu0 %v1788_v10 }
  0x78   :  { %252 = vmatprep.subr.mxu0 %v1794_v21 }
  0x79   :  { %253 = vmatpush2.msra.mxu0 %v149_v28 }
  0x7a   :  { %254 = vmatprep.subr.mxu0 %v148_v54 }
  0x7b   :  { %255 = vmatpush2.msra.mxu0 %v147_v35 }
  0x7c   :  { %256 = vmatprep.subr.mxu0 %v146_v52 }
  0x7d   :  { %257 = vmatpush2.msra.mxu0 %v145_v62 }
  0x7e   :  { %259 = vmatmul.mubr.f32.vlgmr.msra.gmra.mxu0 %v1648_v27  ;;  %490 = vmatprep.subr.mxu0 %v1588_v0  ;;  %v1853_v0 = vld [vmem:[#allocation7 + $0x98] sm:$0xff] }
  0x7f   :  { %491 = vmatpush1.msra.mxu0 %v1590_v1  ;;  %1031 = vmatprep.subr.mxu1 %v1853_v0  ;;  %v1856_v1 = vld [vmem:[#allocation7 + $0x18] sm:$0xff] }
  0x80   :  { %492 = vmatprep.subr.mxu0 %v1592_v2  ;;  %1032 = vmatpush3.msra.mxu1 %v1856_v1  ;;  %v1859_v2 = vld [vmem:[#allocation7 + $0x90] sm:$0xff] }
  0x81   :  { %493 = vmatpush1.msra.mxu0 %v1595_v3  ;;  %1033 = vmatprep.subr.mxu1 %v1859_v2  ;;  %v1862_v3 = vld [vmem:[#allocation7 + $0x10] sm:$0xff] }
  0x82   :  { %494 = vmatprep.subr.mxu0 %v1598_v4  ;;  %1034 = vmatpush3.msra.mxu1 %v1862_v3  ;;  %v1865_v4 = vld [vmem:[#allocation7 + $0x88] sm:$0xff] }
  0x83   :  { %495 = vmatpush1.msra.mxu0 %v1601_v5  ;;  %v1867_v5 = vld [vmem:[#allocation7 + $0x8] sm:$0xff]  ;;  %1035 = vmatprep.subr.mxu1 %v1865_v4 }
  0x84   :  { %496 = vmatprep.subr.mxu0 %v1604_v6  ;;  %v1869_v6 = vld [vmem:[#allocation7 + $0x80] sm:$0xff]  ;;  %1036 = vmatpush3.msra.mxu1 %v1867_v5 }
  0x85   :  { %497 = vmatpush1.msra.mxu0 %v1607_v7  ;;  %v1872_v7 = vld [vmem:[#allocation7] sm:$0xff]  ;;  %1037 = vmatprep.subr.mxu1 %v1869_v6 }
  0x86   :  { %498 = vmatprep.subr.mxu0 %v1610_v11  ;;  %1038 = vmatpush3.msra.mxu1 %v1872_v7  ;;  %v1515_v11 = vmov 0.0  }
  0x87   :  { %499 = vmatpush1.msra.mxu0 %v1613_v12  ;;  %1162 = vmatprep.subr.mxu1 %v1515_v11 }
  0x88   :  { %500 = vmatprep.subr.mxu0 %v1616_v13 }
  0x89   :  { %501 = vmatpush1.msra.mxu0 %v1619_v14 }
  0x8a   :  { %502 = vmatprep.subr.mxu0 %v1624_v17 }
  0x8b   :  { %503 = vmatpush1.msra.mxu0 %v1627_v18 }
  0x8c   :  { %504 = vmatprep.subr.mxu0 %v1630_v19  ;;  %v166_v19 = vsub.s32 0, %v1621_v15 }
  0x8d   :  { %505 = vmatpush1.msra.mxu0 %v1633_v20  ;;  %v107_v20 = vld [vmem:[%s2102_s6] sm:$0x3] }
  0x8e   :  { %506 = vmatprep.subr.mxu0 %v1637_v22  ;;  %v170_v22 = vsub.s32 1, %v1621_v15  ;;  %v1897_v15 = vld [vmem:[#allocation8 + $0x68] sm:$0xff] }
  0x8f   :  { %507 = vmatpush1.msra.mxu0 %v1640_v23  ;;  %v1885_v23 = vrot.slane %v107_v20, %v166_v19  ;;  %v724_v19 = vld [vmem:[#allocation10 + $0x98] sm:$0xff] }
  0x90   :  { %508 = vmatprep.subr.mxu0 %v1643_v24  ;;  %v1887_v24 = vrot.slane %v107_v20, %v170_v22 }
  0x91   :  { %509 = vmatpush1.msra.mxu0 %v1645_v25 }
  0x92   :  { %510 = vmatprep.subr.mxu0 %v1657_v32 }
  0x93   :  { %511 = vmatpush1.msra.mxu0 %v1661_v33 }
  0x94   :  { %512 = vmatprep.subr.mxu0 %v1667_v36 }
  0x95   :  { %513 = vmatpush1.msra.mxu0 %v1671_v37 }
  0x96   :  { %514 = vmatprep.subr.mxu0 %v1677_v39  ;;  %v1891_v39 = vld [vmem:[#allocation8 + $0x78] sm:$0xff] }
  0x97   :  { %515 = vmatpush1.msra.mxu0 %v1682_v42  ;;  %v1893_v42 = vld [vmem:[#allocation8 + $0x70] sm:$0xff] }
  0x98   :  { %516 = vmatprep.subr.mxu0 %v1685_v43  ;;  %v1901_v43 = vld [vmem:[#allocation8 + $0x60] sm:$0xff] }
  0x99   :  { %517 = vmatpush1.msra.mxu0 %v1691_v45  ;;  %v1905_v45 = vld [vmem:[#allocation8 + $0x58] sm:$0xff] }
  0x9a   :  { %518 = vmatprep.subr.mxu0 %v1697_v47  ;;  %v1909_v47 = vld [vmem:[#allocation8 + $0x50] sm:$0xff] }
  0x9b   :  { %519 = vmatpush1.msra.mxu0 %v1702_v49  ;;  %v1913_v49 = vld [vmem:[#allocation8 + $0x48] sm:$0xff] }
  0x9c   :  { %520 = vmatprep.subr.mxu0 %v1708_v51  ;;  %v1917_v51 = vld [vmem:[#allocation8 + $0x40] sm:$0xff] }
  0x9d   :  { %521 = vmatpush1.msra.mxu0 %v1714_v53  ;;  %v1925_v53 = vld [vmem:[#allocation8 + $0x30] sm:$0xff] }
  0x9e   :  { %1002 = vmatprep.subr.msk.mxu0 %vm187_vm1, %v1720_v55  ;;  %v1933_v55 = vld [vmem:[#allocation8 + $0x20] sm:$0xff] }
  0x9f   :  { %1003 = vmatpush2.msk.msra.mxu0 %vm187_vm1, %v1726_v57  ;;  %v1939_v57 = vld [vmem:[#allocation8 + $0x18] sm:$0xff] }
  0xa0   :  { %538 = vmatprep.subr.mxu0 %v1732_v59  ;;  %v1943_v59 = vld [vmem:[#allocation8 + $0x10] sm:$0xff] }
  0xa1   :  { %539 = vmatpush2.msra.mxu0 %v1739_v61  ;;  %v1947_v61 = vld [vmem:[#allocation8 + $0x8] sm:$0xff] }
  0xa2   :  { %540 = vmatprep.subr.mxu0 %v1746_v63 }
  0xa3   :  { %541 = vmatpush2.msra.mxu0 %v1752_v9 }
  0xa4   :  { %542 = vmatprep.subr.mxu0 %v1758_v16 }
  0xa5   :  { %543 = vmatpush2.msra.mxu0 %v1764_v26 }
  0xa6   :  { %544 = vmatprep.subr.mxu0 %v1770_v34 }
  0xa7   :  { %545 = vmatpush2.msra.mxu0 %v1776_v40  ;;  %v2129_v40 = vld [vmem:[#allocation20_spill] sm:$0xff] }
  0xa8   :  { %546 = vmatprep.subr.mxu0 %v1782_v8 }
  0xa9   :  { %547 = vmatpush2.msra.mxu0 %v1788_v10  ;;  %v1962_v10 = vld [vmem:[%s2102_s6 + $0x2] ss:$0 sm:$0xff] }
  0xaa   :  { %548 = vmatprep.subr.mxu0 %v1794_v21 }
  0xab   :  { %549 = vmatpush2.msra.mxu0 %v149_v28 }
  0xac   :  { %550 = vmatprep.subr.mxu0 %v148_v54  ;;  %v1929_v54 = vld [vmem:[#allocation8 + $0x28] sm:$0xff] }
  0xad   :  { %551 = vmatpush2.msra.mxu0 %v147_v35 }
  0xae   :  { %552 = vmatprep.subr.mxu0 %v146_v52  ;;  %v1921_v52 = vld [vmem:[#allocation8 + $0x38] sm:$0xff] }
  0xaf   :  { %553 = vmatpush2.msra.mxu0 %v145_v62  ;;  %v1951_v62 = vld [vmem:[#allocation8] sm:$0xff] }
  0xb0   :  { %1232 = vmatprep.subr.mxu0 %v1515_v11 }
  0xca   :  { %v481_v12 = vpop.permute.xlu0 %480 }
  0xcb   :  { %v479_v13 = vpop.permute.xlu1 %478 }
  0xcc   :  { %v485_v17 = vsel %vm484_vm2, %v479_v13, %v481_v12  ;;  %v2139_v13 = vld [vmem:[#allocation30_spill] sm:$0xff] }
  0xce   :  { %v483_v14 = vpop.permute.xlu0 %482 }
  0xcf   :  { %v486_v18 = vsel %vm484_vm2, %v481_v12, %v483_v14  ;;  %v2131_v12 = vld [vmem:[#allocation22_spill] sm:$0xff] }
  0xd0   :  { %1004 = vmatprep.mubr.msk.f32.mxu0 %vm184_vm0, %v486_v18  ;;  %v725_v18 = vld [vmem:[#allocation10 + $0xa0] sm:$0xff] }
  0xd1   :  { %555 = vmatmul.mubr.f32.vlgmr.msra.gmra.mxu0 %v485_v17 }
  0xd2   :  { %1264 = vmatprep.mubr.msk.f32.mxu0 %vm1516_vm3, %v1515_v11 }
 0x13e   :  { %v260_v25 = vpop.f32.mrf.mxu0 }
 0x13f   :  { %v261_v27 = vadd.f32 %v260_v25, %v1885_v23 }
 0x140   :  { %v262_v32 = vpop.f32.mrf.mxu0 }
 0x141   :  { %v263_v33 = vadd.f32 %v262_v32, %v1887_v24  ;;  %v265_v37 = vmax.f32 %v261_v27, 0.0 }
 0x143   :  { %v266_v36 = vmax.f32 %v263_v33, 0.0  ;;  %v720_v33 = vld [vmem:[#allocation10 + $0x78] sm:$0xff] }
 0x145   :  { %369 = vmatprep.mubr.f32.mxu1 %v266_v36  ;;  %v719_v36 = vld [vmem:[#allocation10 + $0x70] sm:$0xff] }
 0x146   :  { %370 = vmatmul.mubr.f32.vlgmr.msra.gmra.mxu1 %v265_v37  ;;  %v718_v37 = vld [vmem:[#allocation10 + $0x68] sm:$0xff] }
 0x147   :  { %1163 = vmatpush3.msra.mxu1 %v1891_v39  ;;  %1194 = vmatprep.mubr.msk.f32.mxu1 %vm1516_vm3, %v1515_v11 }
 0x148   :  { %1164 = vmatprep.subr.mxu1 %v1515_v11 }
 0x149   :  { %1165 = vmatpush3.msra.mxu1 %v1893_v42 }
 0x14a   :  { %1166 = vmatprep.subr.mxu1 %v1515_v11 }
 0x14b   :  { %1167 = vmatpush3.msra.mxu1 %v1897_v15 }
 0x14c   :  { %1168 = vmatprep.subr.mxu1 %v1515_v11 }
 0x14d   :  { %1169 = vmatpush3.msra.mxu1 %v1901_v43 }
 0x14e   :  { %1170 = vmatprep.subr.mxu1 %v1515_v11 }
 0x14f   :  { %1171 = vmatpush3.msra.mxu1 %v1905_v45 }
 0x150   :  { %1172 = vmatprep.subr.mxu1 %v1515_v11 }
 0x151   :  { %1173 = vmatpush3.msra.mxu1 %v1909_v47 }
 0x152   :  { %1174 = vmatprep.subr.mxu1 %v1515_v11 }
 0x153   :  { %1175 = vmatpush3.msra.mxu1 %v1913_v49 }
 0x154   :  { %1176 = vmatprep.subr.mxu1 %v1515_v11 }
 0x155   :  { %1177 = vmatpush3.msra.mxu1 %v1917_v51 }
 0x156   :  { %1178 = vmatprep.subr.mxu1 %v1515_v11 }
 0x157   :  { %1179 = vmatpush3.msra.mxu1 %v1921_v52 }
 0x158   :  { %1180 = vmatprep.subr.mxu1 %v1515_v11 }
 0x159   :  { %1181 = vmatpush3.msra.mxu1 %v1925_v53 }
 0x15a   :  { %1182 = vmatprep.subr.mxu1 %v1515_v11 }
 0x15b   :  { %1183 = vmatpush3.msra.mxu1 %v1929_v54 }
 0x15c   :  { %1184 = vmatprep.subr.mxu1 %v1515_v11 }
 0x15d   :  { %1185 = vmatpush3.msra.mxu1 %v1933_v55 }
 0x15e   :  { %1186 = vmatprep.subr.mxu1 %v1515_v11 }
 0x15f   :  { %1187 = vmatpush3.msra.mxu1 %v1939_v57 }
 0x160   :  { %1188 = vmatprep.subr.mxu1 %v1515_v11 }
 0x161   :  { %1189 = vmatpush3.msra.mxu1 %v1943_v59 }
 0x162   :  { %1190 = vmatprep.subr.mxu1 %v1515_v11 }
 0x163   :  { %1191 = vmatpush3.msra.mxu1 %v1947_v61 }
 0x164   :  { %1192 = vmatprep.subr.mxu1 %v1515_v11 }
 0x165   :  { %1193 = vmatpush3.msra.mxu1 %v1951_v62 }
 0x166   :  { %1059 = vmatprep.subr.mxu1 %v1650_v29  ;;  %v2128_v29 = vld [vmem:[#allocation19_spill] sm:$0xff] }
 0x191   :  { %v556_v63 = vpop.f32.mrf.mxu0 }
 0x192   :  { %v557_v14 = vadd.f32 %v556_v63, %v1885_v23  ;;  %v723_v63 = vld [vmem:[#allocation10 + $0x90] sm:$0xff] }
 0x193   :  { %v558_v8 = vpop.f32.mrf.mxu0 }
 0x194   :  { %v559_v21 = vadd.f32 %v558_v8, %v1887_v24  ;;  %v561_v17 = vmax.f32 %v557_v14, 0.0  ;;  %v722_v8 = vld [vmem:[#allocation10 + $0x88] sm:$0xff]  ;;  %v887_v14 = vld [vmem:[#allocation11 + $0x10] sm:$0xff] }
 0x196   :  { %v562_v34 = vmax.f32 %v559_v21, 0.0 }
 0x206   :  { %v1039_v9 = vpop.f32.mrf.mxu1 }
 0x208   :  { %v1040_v16 = vpop.f32.mrf.mxu1 }
 0x209   :  { %v1041_v26 = vadd.f32 %v1040_v16, %v1039_v9  ;;  %v721_v9 = vld [vmem:[#allocation10 + $0x80] sm:$0xff] }
 0x20b   :  { %v372_v28 = vadd.f32 %v1041_v26, %v1962_v10 }
 0x20d   :  { %v375_v35 = vmax.f32 %v372_v28, 0.0  ;;  %v900_v28 = vld [vmem:[#allocation11 + $0x78] sm:$0xff] }
 0x20f   :  { %1195 = vmatmul.mubr.f32.vlgmr.msra.gmra.mxu1 %v375_v35  ;;  %v898_v35 = vld [vmem:[#allocation11 + $0x68] sm:$0xff] }
 0x210   :  { %1060 = vmatpush3.msra.mxu1 %v1652_v30  ;;  %627 = vmatprep.mubr.f32.mxu1 %v562_v34  ;;  %v2130_v30 = vld [vmem:[#allocation21_spill] sm:$0xff] }
 0x211   :  { %1061 = vmatprep.subr.mxu1 %v1654_v31  ;;  %v2132_v31 = vld [vmem:[#allocation23_spill] sm:$0xff]  ;;  %v899_v34 = vld [vmem:[#allocation11 + $0x70] sm:$0xff] }
 0x212   :  { %1062 = vmatpush3.msra.mxu1 %v1674_v38  ;;  %v2133_v38 = vld [vmem:[#allocation24_spill] sm:$0xff] }
 0x213   :  { %1063 = vmatprep.subr.mxu1 %v1679_v41  ;;  %v2134_v41 = vld [vmem:[#allocation25_spill] sm:$0xff] }
 0x214   :  { %1064 = vmatpush3.msra.mxu1 %v1688_v44  ;;  %v2135_v44 = vld [vmem:[#allocation26_spill] sm:$0xff] }
 0x215   :  { %1065 = vmatprep.subr.mxu1 %v1694_v46  ;;  %v2136_v46 = vld [vmem:[#allocation27_spill] sm:$0xff] }
 0x216   :  { %1066 = vmatpush3.msra.mxu1 %v1699_v48  ;;  %v2137_v48 = vld [vmem:[#allocation28_spill] sm:$0xff] }
 0x217   :  { %1067 = vmatprep.subr.mxu1 %v1705_v50  ;;  %v2138_v50 = vld [vmem:[#allocation29_spill] sm:$0xff] }
 0x218   :  { %1068 = vmatpush3.msra.mxu1 %v2128_v29  ;;  %v897_v29 = vld [vmem:[#allocation11 + $0x60] sm:$0xff] }
 0x219   :  { %1069 = vmatprep.subr.mxu1 %v2129_v40  ;;  %v896_v40 = vld [vmem:[#allocation11 + $0x58] sm:$0xff] }
 0x21a   :  { %1070 = vmatpush3.msra.mxu1 %v2130_v30  ;;  %v895_v30 = vld [vmem:[#allocation11 + $0x50] sm:$0xff] }
 0x21b   :  { %1071 = vmatprep.subr.mxu1 %v2131_v12  ;;  %v894_v12 = vld [vmem:[#allocation11 + $0x48] sm:$0xff] }
 0x21c   :  { %1072 = vmatpush3.msra.mxu1 %v2132_v31  ;;  %v893_v31 = vld [vmem:[#allocation11 + $0x40] sm:$0xff] }
 0x21d   :  { %1073 = vmatprep.subr.mxu1 %v2133_v38  ;;  %v892_v38 = vld [vmem:[#allocation11 + $0x38] sm:$0xff] }
 0x21e   :  { %1074 = vmatpush3.msra.mxu1 %v2134_v41  ;;  %v891_v41 = vld [vmem:[#allocation11 + $0x30] sm:$0xff] }
 0x21f   :  { %1075 = vmatprep.subr.mxu1 %v2135_v44  ;;  %v890_v44 = vld [vmem:[#allocation11 + $0x28] sm:$0xff] }
 0x220   :  { %1076 = vmatpush3.msra.mxu1 %v2136_v46  ;;  %v889_v46 = vld [vmem:[#allocation11 + $0x20] sm:$0xff] }
 0x221   :  { %1077 = vmatprep.subr.mxu1 %v2137_v48 }
 0x222   :  { %1078 = vmatpush3.msra.mxu1 %v2138_v50 }
 0x223   :  { %1079 = vmatprep.subr.mxu1 %v2139_v13  ;;  %v888_v13 = vld [vmem:[#allocation11 + $0x18] sm:$0xff] }
 0x224   :  { %1080 = vmatpush3.msra.mxu1 %v1785_v60  ;;  %v734_v60 = vld [vmem:[#allocation10 + $0xe8] sm:$0xff] }
 0x225   :  { %1081 = vmatprep.subr.mxu1 %v1791_v58  ;;  %v735_v58 = vld [vmem:[#allocation10 + $0xf0] sm:$0xff] }
 0x226   :  { %1082 = vmatpush3.msra.mxu1 %v1797_v56  ;;  %v736_v56 = vld [vmem:[#allocation10 + $0xf8] sm:$0xff] }
 0x227   :  { %1083 = vmatprep.subr.mxu1 %v1853_v0  ;;  %1233 = vmatpush3.msra.mxu0 %v736_v56  ;;  %v733_v0 = vld [vmem:[#allocation10 + $0xe0] sm:$0xff] }
 0x228   :  { %1084 = vmatpush3.msra.mxu1 %v1856_v1  ;;  %1234 = vmatprep.subr.mxu0 %v1515_v11  ;;  %v732_v1 = vld [vmem:[#allocation10 + $0xd8] sm:$0xff]  ;;  %v885_v56 = vld [vmem:[#allocation11] sm:$0xff] }
 0x229   :  { %1085 = vmatprep.subr.mxu1 %v1859_v2  ;;  %1235 = vmatpush3.msra.mxu0 %v735_v58  ;;  %v731_v2 = vld [vmem:[#allocation10 + $0xd0] sm:$0xff]  ;;  %v1005_v58 = vld [vmem:[%s2102_s6 + $0x4] ss:$0 sm:$0xff] }
 0x22a   :  { %1086 = vmatpush3.msra.mxu1 %v1862_v3  ;;  %1236 = vmatprep.subr.mxu0 %v1515_v11  ;;  %v730_v3 = vld [vmem:[#allocation10 + $0xc8] sm:$0xff] }
 0x22b   :  { %1087 = vmatprep.subr.mxu1 %v1865_v4  ;;  %1237 = vmatpush3.msra.mxu0 %v734_v60  ;;  %v729_v4 = vld [vmem:[#allocation10 + $0xc0] sm:$0xff] }
 0x22c   :  { %1088 = vmatpush3.msra.mxu1 %v1867_v5  ;;  %1238 = vmatprep.subr.mxu0 %v1515_v11  ;;  %v728_v5 = vld [vmem:[#allocation10 + $0xb8] sm:$0xff] }
 0x22d   :  { %1089 = vmatprep.subr.mxu1 %v1869_v6  ;;  %1239 = vmatpush3.msra.mxu0 %v733_v0  ;;  %v727_v6 = vld [vmem:[#allocation10 + $0xb0] sm:$0xff] }
 0x22e   :  { %1090 = vmatpush3.msra.mxu1 %v1872_v7  ;;  %1240 = vmatprep.subr.mxu0 %v1515_v11  ;;  %v726_v7 = vld [vmem:[#allocation10 + $0xa8] sm:$0xff] }
 0x22f   :  { %628 = vmatmul.mubr.f32.vlgmr.msra.gmra.mxu1 %v561_v17  ;;  %1197 = vmatprep.subr.mxu1 %v1515_v11  ;;  %v886_v17 = vld [vmem:[#allocation11 + $0x8] sm:$0xff] }
 0x230   :  { %1198 = vmatpush3.msra.mxu1 %v1891_v39  ;;  %1229 = vmatprep.mubr.msk.f32.mxu1 %vm1516_vm3, %v1515_v11  ;;  %v717_v39 = vld [vmem:[#allocation10 + $0x60] sm:$0xff] }
 0x231   :  { %1199 = vmatprep.subr.mxu1 %v1515_v11  ;;  %1241 = vmatpush3.msra.mxu0 %v732_v1 }
 0x232   :  { %1200 = vmatpush3.msra.mxu1 %v1893_v42  ;;  %1242 = vmatprep.subr.mxu0 %v1515_v11  ;;  %v716_v42 = vld [vmem:[#allocation10 + $0x58] sm:$0xff] }
 0x233   :  { %1201 = vmatprep.subr.mxu1 %v1515_v11  ;;  %1243 = vmatpush3.msra.mxu0 %v731_v2 }
 0x234   :  { %1202 = vmatpush3.msra.mxu1 %v1897_v15  ;;  %1244 = vmatprep.subr.mxu0 %v1515_v11  ;;  %v715_v15 = vld [vmem:[#allocation10 + $0x50] sm:$0xff] }
 0x235   :  { %1203 = vmatprep.subr.mxu1 %v1515_v11  ;;  %1245 = vmatpush3.msra.mxu0 %v730_v3 }
 0x236   :  { %1204 = vmatpush3.msra.mxu1 %v1901_v43  ;;  %1246 = vmatprep.subr.mxu0 %v1515_v11  ;;  %v714_v43 = vld [vmem:[#allocation10 + $0x48] sm:$0xff] }
 0x237   :  { %1205 = vmatprep.subr.mxu1 %v1515_v11  ;;  %1247 = vmatpush3.msra.mxu0 %v729_v4  ;;  %v1006_v4 = vld [vmem:[%s2102_s6 + $0x5] ss:$0 sm:$0xff] }
 0x238   :  { %1206 = vmatpush3.msra.mxu1 %v1905_v45  ;;  %1248 = vmatprep.subr.mxu0 %v1515_v11  ;;  %v713_v45 = vld [vmem:[#allocation10 + $0x40] sm:$0xff] }
 0x239   :  { %1207 = vmatprep.subr.mxu1 %v1515_v11  ;;  %1249 = vmatpush3.msra.mxu0 %v728_v5 }
 0x23a   :  { %1208 = vmatpush3.msra.mxu1 %v1909_v47  ;;  %1250 = vmatprep.subr.mxu0 %v1515_v11  ;;  %v712_v47 = vld [vmem:[#allocation10 + $0x38] sm:$0xff] }
 0x23b   :  { %1209 = vmatprep.subr.mxu1 %v1515_v11  ;;  %1251 = vmatpush3.msra.mxu0 %v727_v6 }
 0x23c   :  { %1210 = vmatpush3.msra.mxu1 %v1913_v49  ;;  %1252 = vmatprep.subr.mxu0 %v1515_v11  ;;  %v711_v49 = vld [vmem:[#allocation10 + $0x30] sm:$0xff] }
 0x23d   :  { %1211 = vmatprep.subr.mxu1 %v1515_v11  ;;  %1253 = vmatpush3.msra.mxu0 %v726_v7 }
 0x23e   :  { %1212 = vmatpush3.msra.mxu1 %v1917_v51  ;;  %1254 = vmatprep.subr.mxu0 %v1515_v11  ;;  %v710_v51 = vld [vmem:[#allocation10 + $0x28] sm:$0xff] }
 0x23f   :  { %1213 = vmatprep.subr.mxu1 %v1515_v11  ;;  %1255 = vmatpush3.msra.mxu0 %v725_v18 }
 0x240   :  { %1214 = vmatpush3.msra.mxu1 %v1921_v52  ;;  %1256 = vmatprep.subr.mxu0 %v1515_v11  ;;  %v709_v52 = vld [vmem:[#allocation10 + $0x20] sm:$0xff] }
 0x241   :  { %1215 = vmatprep.subr.mxu1 %v1515_v11  ;;  %1257 = vmatpush3.msra.mxu0 %v724_v19 }
 0x242   :  { %1216 = vmatpush3.msra.mxu1 %v1925_v53  ;;  %1258 = vmatprep.subr.mxu0 %v1515_v11  ;;  %v708_v53 = vld [vmem:[#allocation10 + $0x18] sm:$0xff] }
 0x243   :  { %1217 = vmatprep.subr.mxu1 %v1515_v11  ;;  %1259 = vmatpush3.msra.mxu0 %v723_v63 }
 0x244   :  { %1218 = vmatpush3.msra.mxu1 %v1929_v54  ;;  %v1001_v54 = vld [vmem:[%s2102_s6 + $0x3] ss:$0 sm:$0xff]  ;;  %1260 = vmatprep.subr.mxu0 %v1515_v11 }
 0x245   :  { %1219 = vmatprep.subr.mxu1 %v1515_v11  ;;  %1261 = vmatpush3.msra.mxu0 %v722_v8 }
 0x246   :  { %1220 = vmatpush3.msra.mxu1 %v1933_v55  ;;  %v707_v55 = vld [vmem:[#allocation10 + $0x10] sm:$0xff]  ;;  %1262 = vmatprep.subr.mxu0 %v1515_v11 }
 0x247   :  { %1221 = vmatprep.subr.mxu1 %v1515_v11  ;;  %1263 = vmatpush3.msra.mxu0 %v721_v9 }
 0x248   :  { %1222 = vmatpush3.msra.mxu1 %v1939_v57  ;;  %1302 = vmatprep.subr.mxu0 %v1515_v11 }
 0x249   :  { %1223 = vmatprep.subr.mxu1 %v1515_v11 }
 0x24a   :  { %1224 = vmatpush3.msra.mxu1 %v1943_v59  ;;  %v706_v59 = vld [vmem:[#allocation10 + $0x8] sm:$0xff] }
 0x24b   :  { %1225 = vmatprep.subr.mxu1 %v1515_v11 }
 0x24c   :  { %1226 = vmatpush3.msra.mxu1 %v1947_v61  ;;  %v705_v61 = vld [vmem:[#allocation10] sm:$0xff] }
 0x24d   :  { %1227 = vmatprep.subr.mxu1 %v1515_v11 }
 0x24e   :  { %1228 = vmatpush3.msra.mxu1 %v1951_v62 }
 0x24f   :  { %1267 = vmatprep.subr.mxu1 %v1515_v11 }
 0x2cf   :  { %v464_v20 = vpop.f32.mrf.mxu1 }
 0x2d0   :  { %v465_v57 = vadd.f32 %v1001_v54, %v464_v20 }
 0x2d1   :  { %v1196_v22 = vpop.f32.mrf.mxu1 }
 0x2d2   :  { %v468_v62 = vmax.f32 %v465_v57, 0.0 }
 0x2ef   :  { %v1091_v23 = vpop.f32.mrf.mxu1 }
 0x2f1   :  { %v1092_v24 = vpop.f32.mrf.mxu1 }
 0x2f2   :  { %v1093_v25 = vadd.f32 %v1092_v24, %v1091_v23 }
 0x2f4   :  { %v630_v27 = vadd.f32 %v1093_v25, %v1962_v10 }
 0x2f6   :  { %v633_v32 = vmax.f32 %v630_v27, 0.0 }
 0x2f8   :  { %1230 = vmatmul.mubr.f32.vlgmr.msra.gmra.mxu1 %v633_v32 }
 0x2f9   :  { %1268 = vmatpush3.msra.mxu1 %v720_v33  ;;  %1299 = vmatprep.mubr.msk.f32.mxu1 %vm1516_vm3, %v1515_v11 }
 0x2fa   :  { %1269 = vmatprep.subr.mxu1 %v1515_v11 }
 0x2fb   :  { %1270 = vmatpush3.msra.mxu1 %v719_v36 }
 0x2fc   :  { %1271 = vmatprep.subr.mxu1 %v1515_v11 }
 0x2fd   :  { %1272 = vmatpush3.msra.mxu1 %v718_v37 }
 0x2fe   :  { %1273 = vmatprep.subr.mxu1 %v1515_v11 }
 0x2ff   :  { %1274 = vmatpush3.msra.mxu1 %v717_v39 }
 0x300   :  { %1275 = vmatprep.subr.mxu1 %v1515_v11 }
 0x301   :  { %1276 = vmatpush3.msra.mxu1 %v716_v42 }
 0x302   :  { %1277 = vmatprep.subr.mxu1 %v1515_v11 }
 0x303   :  { %1278 = vmatpush3.msra.mxu1 %v715_v15 }
 0x304   :  { %1279 = vmatprep.subr.mxu1 %v1515_v11 }
 0x305   :  { %1280 = vmatpush3.msra.mxu1 %v714_v43 }
 0x306   :  { %1281 = vmatprep.subr.mxu1 %v1515_v11 }
 0x307   :  { %1282 = vmatpush3.msra.mxu1 %v713_v45 }
 0x308   :  { %1283 = vmatprep.subr.mxu1 %v1515_v11 }
 0x309   :  { %1284 = vmatpush3.msra.mxu1 %v712_v47 }
 0x30a   :  { %1285 = vmatprep.subr.mxu1 %v1515_v11 }
 0x30b   :  { %1286 = vmatpush3.msra.mxu1 %v711_v49 }
 0x30c   :  { %1287 = vmatprep.subr.mxu1 %v1515_v11 }
 0x30d   :  { %1288 = vmatpush3.msra.mxu1 %v710_v51 }
 0x30e   :  { %1289 = vmatprep.subr.mxu1 %v1515_v11 }
 0x30f   :  { %1290 = vmatpush3.msra.mxu1 %v709_v52 }
 0x310   :  { %1291 = vmatprep.subr.mxu1 %v1515_v11 }
 0x311   :  { %1292 = vmatpush3.msra.mxu1 %v708_v53 }
 0x312   :  { %1293 = vmatprep.subr.mxu1 %v1515_v11 }
 0x313   :  { %1294 = vmatpush3.msra.mxu1 %v707_v55 }
 0x314   :  { %1295 = vmatprep.subr.mxu1 %v1515_v11 }
 0x315   :  { %1296 = vmatpush3.msra.mxu1 %v706_v59 }
 0x316   :  { %1297 = vmatprep.subr.mxu1 %v1515_v11 }
 0x317   :  { %1298 = vmatpush3.msra.mxu1 %v705_v61 }
 0x318   :  { %1300 = vmatmul.mubr.f32.vlgmr.msra.gmra.mxu1 %v468_v62 }
 0x3b8   :  { %v700_v10 = vpop.f32.mrf.mxu1 }
 0x3b9   :  { %v701_v16 = vadd.f32 %v1001_v54, %v700_v10 }
 0x3ba   :  { %v1231_v21 = vpop.f32.mrf.mxu1 }
 0x3bb   :  { %v704_v26 = vmax.f32 %v701_v16, 0.0 }
 0x3bd   :  { %1265 = vmatmul.mubr.f32.vlgmr.msra.gmra.mxu0 %v704_v26 }
 0x3be   :  { %1303 = vmatpush3.msra.mxu0 %v900_v28  ;;  %1334 = vmatprep.mubr.msk.f32.mxu0 %vm1516_vm3, %v1515_v11 }
 0x3bf   :  { %1304 = vmatprep.subr.mxu0 %v1515_v11 }
 0x3c0   :  { %1305 = vmatpush3.msra.mxu0 %v899_v34 }
 0x3c1   :  { %1306 = vmatprep.subr.mxu0 %v1515_v11 }
 0x3c2   :  { %1307 = vmatpush3.msra.mxu0 %v898_v35 }
 0x3c3   :  { %1308 = vmatprep.subr.mxu0 %v1515_v11 }
 0x3c4   :  { %1309 = vmatpush3.msra.mxu0 %v897_v29 }
 0x3c5   :  { %1310 = vmatprep.subr.mxu0 %v1515_v11 }
 0x3c6   :  { %1311 = vmatpush3.msra.mxu0 %v896_v40 }
 0x3c7   :  { %1312 = vmatprep.subr.mxu0 %v1515_v11 }
 0x3c8   :  { %1313 = vmatpush3.msra.mxu0 %v895_v30 }
 0x3c9   :  { %1314 = vmatprep.subr.mxu0 %v1515_v11 }
 0x3ca   :  { %1315 = vmatpush3.msra.mxu0 %v894_v12 }
 0x3cb   :  { %1316 = vmatprep.subr.mxu0 %v1515_v11 }
 0x3cc   :  { %1317 = vmatpush3.msra.mxu0 %v893_v31 }
 0x3cd   :  { %1318 = vmatprep.subr.mxu0 %v1515_v11 }
 0x3ce   :  { %1319 = vmatpush3.msra.mxu0 %v892_v38 }
 0x3cf   :  { %1320 = vmatprep.subr.mxu0 %v1515_v11 }
 0x3d0   :  { %1321 = vmatpush3.msra.mxu0 %v891_v41 }
 0x3d1   :  { %1322 = vmatprep.subr.mxu0 %v1515_v11 }
 0x3d2   :  { %1323 = vmatpush3.msra.mxu0 %v890_v44 }
 0x3d3   :  { %1324 = vmatprep.subr.mxu0 %v1515_v11 }
 0x3d4   :  { %1325 = vmatpush3.msra.mxu0 %v889_v46 }
 0x3d5   :  { %1326 = vmatprep.subr.mxu0 %v1515_v11 }
 0x3d6   :  { %1327 = vmatpush3.msra.mxu0 %v888_v13 }
 0x3d7   :  { %1328 = vmatprep.subr.mxu0 %v1515_v11 }
 0x3d8   :  { %v873_v48 = vpop.f32.mrf.mxu1  ;;  %1329 = vmatpush3.msra.mxu0 %v887_v14 }
 0x3d9   :  { %1330 = vmatprep.subr.mxu0 %v1515_v11 }
 0x3da   :  { %v1301_v50 = vpop.f32.mrf.mxu1  ;;  %1331 = vmatpush3.msra.mxu0 %v886_v17 }
 0x3db   :  { %1332 = vmatprep.subr.mxu0 %v1515_v11 }
 0x3dc   :  { %1333 = vmatpush3.msra.mxu0 %v885_v56 }
 0x47d   :  { %v803_v60 = vpop.f32.mrf.mxu0 }
 0x47e   :  { %v874_v0 = vadd.f32 %v873_v48, %v803_v60 }
 0x47f   :  { %v1266_v1 = vpop.f32.mrf.mxu0 }
 0x480   :  { %v883_v2 = vadd.f32 %v1005_v58, %v874_v0 }
 0x482   :  { %v884_v3 = vmax.f32 %v883_v2, 0.0 }
 0x484   :  { %1335 = vmatmul.mubr.f32.vlgmr.msra.gmra.mxu0 %v884_v3 }
 0x544   :  { %v973_v5 = vpop.f32.mrf.mxu0 }
 0x545   :  { %v974_v11 = vadd.f32 %v1006_v4, %v973_v5 }
 0x546   :  { %v1336_v6 = vpop.f32.mrf.mxu0 }
 0x547   :  { %978 = vst.msk [vmem:[#allocation13] sm:$0x3] %vm977_vm4, %v974_v11 }
 0x548   :  { %1484 = shalt.err (!%p1481_p6)
}
 0x549   :  { %988 = dma.vmem_to_hbm [thread:$0]  %s986_s17, 32, %s2103_s7, [#allocation4]  }
 0x54a   :  { %1501 = dma.done.wait [#allocation4], 32  }
 0x54b   :  { %1502 = vsyncadd [#allocation4], 4294967264 }
 0x54c   :  { %992 = vsyncpa [#allocation3], 1 }
 0x54d   :  { %993 = vsyncpa [#allocation6], 1 }
 0x54e   :  { %994 = vsyncpa [#allocation9], 1 }
 0x54f   :  { %995 = vsyncpa [#allocation12], 1 }
 0x550   :  { %996 = vsyncpa [#allocation4], 1 }

</bundles_post_ra>
